<compile_context>
chip_gen: v6e
topology: v6e:2x2x1
jax: 0.10.0
libtpu: 0.0.40
codegen_flags: <defaults>
</compile_context>

<pallas_src>
import functools

import jax
import jax.numpy as jnp
from jax.experimental import pallas as pl
from jax.experimental.pallas import tpu as pltpu

_LANES = 128


def _is_v7x():
    try:
        kind = jax.devices()[0].device_kind.lower().replace(" ", "")
    except Exception:
        return False
    return ("v7" in kind) or ("tpu7" in kind)


def _focal_kernel(x_ref, t_ref, out_ref, *, gamma, n_valid, tile_rows, has_pad):
    """One grid step processes a (tile_rows, 128) tile of flattened elements.

    out_ref : (1, 128) f32 output block, resident across the reduction axis
              (s); holds the running per-lane partial sum for this chunk.
    """
    p = pl.program_id(0)           # parallel chunk (megacore split on v7x)
    s = pl.program_id(1)           # reduction step within the chunk
    num_s = pl.num_programs(1)

    @pl.when(s == 0)
    def _():
        out_ref[...] = jnp.zeros_like(out_ref)

    x = x_ref[...].astype(jnp.float32)
    t = t_ref[...].astype(jnp.float32)

    # Shared-exponential binary focal loss (3 EUP ops / element):
    #   sgn = x*(2t-1);  e = exp(-|sgn|);  lp = log1p(e)
    #   bce      = softplus(-sgn)     = max(-sgn, 0) + lp
    #   invprobs = log_sigmoid(-sgn)  = -(max(sgn, 0) + lp)
    #   loss     = exp(gamma*invprobs) * bce
    sgn = x * (t * 2.0 - 1.0)
    e = jnp.exp(-jnp.abs(sgn))
    lp = jnp.log1p(e)
    bce = jnp.maximum(-sgn, 0.0) + lp
    invprobs = -(jnp.maximum(sgn, 0.0) + lp)
    loss = jnp.exp(invprobs * gamma) * bce          # (tile_rows, 128) f32

    if has_pad:
        tile_elems = tile_rows * _LANES
        start = (p * num_s + s) * tile_elems        # int32; fine below 2^31
        need_mask = (start + tile_elems) > n_valid

        @pl.when(need_mask)
        def _():
            row_ids = jax.lax.broadcasted_iota(jnp.int32, (tile_rows, _LANES), 0)
            lane_ids = jax.lax.broadcasted_iota(jnp.int32, (tile_rows, _LANES), 1)
            flat = start + row_ids * _LANES + lane_ids
            masked = jnp.where(flat < n_valid, loss, 0.0)
            out_ref[...] += jnp.sum(masked, axis=0, keepdims=True)

        @pl.when(jnp.logical_not(need_mask))
        def _():
            out_ref[...] += jnp.sum(loss, axis=0, keepdims=True)
    else:
        out_ref[...] += jnp.sum(loss, axis=0, keepdims=True)


def focal_loss(inputs, target, gamma, *, tile_rows=None, num_chunks=None):
    """Pallas implementation of FocalLoss.forward (returns a scalar)."""
    # mirror torch: target.squeeze(1), then shape check
    t = target
    if t.ndim >= 2 and t.shape[1] == 1:
        t = jnp.squeeze(t, axis=1)
    if t.shape != inputs.shape:
        raise ValueError(
            "Target size ({}) must be the same as input size ({})".format(
                t.shape, inputs.shape))

    x_flat = inputs.reshape(-1)
    t_flat = t.reshape(-1)
    n_valid = x_flat.shape[0]
    if n_valid == 0:
        return jnp.float32(jnp.nan)          # torch: mean of an empty tensor

    # Lane alignment only: pad <=127 elements, and none at all when the element
    # count is already a multiple of 128 (no extra HBM pass in that case).
    pad = (-n_valid) % _LANES
    if pad:
        x_flat = jnp.pad(x_flat, (0, pad))
        t_flat = jnp.pad(t_flat, (0, pad))
    rows = (n_valid + pad) // _LANES
    x2 = x_flat.reshape(rows, _LANES)
    t2 = t_flat.reshape(rows, _LANES)

    v7x = _is_v7x()
    if num_chunks is None:
        num_chunks = 2 if v7x else 1          # megacore split only on 2-TC chips
    if tile_rows is None:
        tile_rows = 8192 if v7x else 4096     # v5e scoped-VMEM default is 16 MiB

    # Sublane-aligned tile that never exceeds the array; the ragged edge block
    # is handled by Pallas + the in-kernel mask (no whole-tile padding copy).
    tr = min(int(tile_rows), rows)
    if tr >= 8:
        tr = (tr // 8) * 8
    nblocks = pl.cdiv(rows, tr)
    P = max(1, min(int(num_chunks), nblocks))
    S = pl.cdiv(nblocks, P)

    if P * S == nblocks:
        in_index = lambda p, s: (p * S + s, 0)
    else:
        # A few trailing steps of the last chunk re-read the final block; their
        # contribution is zeroed by the in-kernel mask.
        last = nblocks - 1
        in_index = lambda p, s: (jnp.minimum(p * S + s, last), 0)

    in_spec = pl.BlockSpec((tr, _LANES), in_index)
    out_spec = pl.BlockSpec((1, _LANES), lambda p, s: (0, p))

    covered = P * S * tr * _LANES
    kernel = functools.partial(
        _focal_kernel,
        gamma=float(gamma),
        n_valid=int(n_valid),
        tile_rows=tr,
        has_pad=(covered != n_valid),
    )

    partials = pl.pallas_call(
        kernel,
        out_shape=jax.ShapeDtypeStruct((1, P * _LANES), jnp.float32),
        grid_spec=pltpu.PrefetchScalarGridSpec(
            num_scalar_prefetch=0,
            grid=(P, S),
            in_specs=[in_spec, in_spec],
            out_specs=out_spec,
        ),
        compiler_params=pltpu.CompilerParams(
            dimension_semantics=("parallel", "arbitrary")),
    )(x2, t2)

    return jnp.sum(partials) / jnp.float32(n_valid)


def _focal_loss_ref(inputs, target, gamma):
    """Pure-JAX reference mirroring the PyTorch forward (f32 compute)."""
    t = target
    if t.ndim >= 2 and t.shape[1] == 1:
        t = jnp.squeeze(t, axis=1)
    x = inputs.astype(jnp.float32)
    t = t.astype(jnp.float32)
    max_val = jnp.maximum(-x, 0.0)
    loss = (x - x * t + max_val
            + jnp.log(jnp.exp(-max_val) + jnp.exp(-x - max_val)))
    invprobs = jax.nn.log_sigmoid(-x * (t * 2.0 - 1.0))
    loss = jnp.exp(invprobs * gamma) * loss
    return jnp.mean(loss)


if __name__ == "__main__":
    key = jax.random.PRNGKey(0)
    k1, k2, k3, k4, k5, k6, k7, k8 = jax.random.split(key, 8)
    gamma = 2.0

    # 1) logits (N,H,W), target (N,1,H,W); numel % 128 == 0 -> fully padless.
    N, H, W = 2, 16, 16
    logits = jax.random.normal(k1, (N, H, W), dtype=jnp.float32)
    target = (jax.random.uniform(k2, (N, 1, H, W)) > 0.5).astype(jnp.float32)
    out = jax.block_until_ready(focal_loss(logits, target, gamma))
    ref = jax.block_until_ready(_focal_loss_ref(logits, target, gamma))
    assert jnp.allclose(out, ref, atol=1e-5, rtol=1e-5), (out, ref)

    # 2) ragged element count (not a multiple of 128) -> in-kernel tail mask.
    logits2 = jax.random.normal(k3, (3, 11, 13), dtype=jnp.float32)
    target2 = (jax.random.uniform(k4, (3, 1, 11, 13)) > 0.5).astype(jnp.float32)
    out2 = jax.block_until_ready(focal_loss(logits2, target2, 1.5))
    ref2 = jax.block_until_ready(_focal_loss_ref(logits2, target2, 1.5))
    assert jnp.allclose(out2, ref2, atol=1e-5, rtol=1e-5), (out2, ref2)

    # 3) multi-block / multi-chunk accumulation path (forced small tile),
    #    including the clamped index-map branch used when nblocks % P != 0.
    logits3 = jax.random.normal(k5, (3, 4, 16, 16), dtype=jnp.float32)
    target3 = (jax.random.uniform(k6, (3, 1, 4, 16, 16)) > 0.5).astype(jnp.float32)
    out3 = jax.block_until_ready(
        focal_loss(logits3, target3, gamma, tile_rows=8, num_chunks=2))
    ref3 = jax.block_until_ready(_focal_loss_ref(logits3, target3, gamma))
    assert jnp.allclose(out3, ref3, atol=1e-5, rtol=1e-5), (out3, ref3)

    # 4) native narrow-width streaming: bf16 logits + int8 target.
    logits4 = jax.random.normal(k7, (2, 16, 16)).astype(jnp.bfloat16)
    target4 = (jax.random.uniform(k8, (2, 1, 16, 16)) > 0.5).astype(jnp.int8)
    out4 = jax.block_until_ready(focal_loss(logits4, target4, gamma))
    ref4 = jax.block_until_ready(_focal_loss_ref(logits4, target4, gamma))
    assert jnp.allclose(out4, ref4, atol=1e-5, rtol=1e-5), (out4, ref4)

    print("KERNEL_OK")
</pallas_src>

<mosaic_0001>
module attributes {stable_mosaic.version = 11 : i64} {
  func.func @_focal_kernel(%arg0: i32, %arg1: i32, %arg2: memref<4x128xf32, #tpu.memory_space<vmem>>, %arg3: memref<4x128xf32, #tpu.memory_space<vmem>>, %arg4: memref<1x128xf32, #tpu.memory_space<vmem>>) attributes {dimension_semantics = [#tpu.dimension_semantics<parallel>, #tpu.dimension_semantics<arbitrary>], iteration_bounds = array<i64: 1, 1>, scalar_prefetch = 0 : i64, scratch_operands = 0 : i64, tpu.core_type = #tpu.core_type<tc>, window_params = [{transform_indices = @transform_0, window_bounds = array<i64: 4, 128>}, {transform_indices = @transform_1, window_bounds = array<i64: 4, 128>}, {transform_indices = @transform_2, window_bounds = array<i64: 1, 128>}]} {
    %c0_i32 = arith.constant 0 : i32
    %0 = arith.cmpi eq, %arg1, %c0_i32 : i32
    %1 = arith.extui %0 : i1 to i32
    %c0_i32_0 = arith.constant 0 : i32
    %2 = arith.cmpi ne, %1, %c0_i32_0 : i32
    scf.if %2 {
      %cst_16 = arith.constant 0.000000e+00 : f32
      %34 = vector.broadcast %cst_16 : f32 to vector<1x128xf32>
      %c0_17 = arith.constant 0 : index
      %c0_18 = arith.constant 0 : index
      %35 = vector.load %arg4[%c0_17, %c0_18] : memref<1x128xf32, #tpu.memory_space<vmem>>, vector<1x128xf32>
      tpu.vector_store %arg4[%c0_17, %c0_18], %34 {strides = array<i32>} : memref<1x128xf32, #tpu.memory_space<vmem>>, vector<1x128xf32>,
    } else {
    }
    %c0 = arith.constant 0 : index
    %c0_1 = arith.constant 0 : index
    %3 = vector.load %arg2[%c0, %c0_1] : memref<4x128xf32, #tpu.memory_space<vmem>>, vector<4x128xf32>
    %c0_2 = arith.constant 0 : index
    %c0_3 = arith.constant 0 : index
    %4 = vector.load %arg3[%c0_2, %c0_3] : memref<4x128xf32, #tpu.memory_space<vmem>>, vector<4x128xf32>
    %cst = arith.constant 2.000000e+00 : f32
    %5 = vector.broadcast %cst : f32 to vector<4x128xf32>
    %6 = arith.mulf %4, %5 : vector<4x128xf32>
    %cst_4 = arith.constant 1.000000e+00 : f32
    %7 = vector.broadcast %cst_4 : f32 to vector<4x128xf32>
    %8 = arith.subf %6, %7 : vector<4x128xf32>
    %9 = arith.mulf %3, %8 : vector<4x128xf32>
    %10 = math.absf %9 : vector<4x128xf32>
    %cst_5 = arith.constant 0.000000e+00 : f32
    %11 = vector.broadcast %cst_5 : f32 to vector<4x128xf32>
    %12 = arith.subf %11, %10 : vector<4x128xf32>
    %13 = math.exp %12 : vector<4x128xf32>
    %14 = math.log1p %13 : vector<4x128xf32>
    %cst_6 = arith.constant 0.000000e+00 : f32
    %15 = vector.broadcast %cst_6 : f32 to vector<4x128xf32>
    %16 = arith.subf %15, %9 : vector<4x128xf32>
    %cst_7 = arith.constant 0.000000e+00 : f32
    %17 = vector.broadcast %cst_7 : f32 to vector<4x128xf32>
    %18 = arith.maximumf %16, %17 : vector<4x128xf32>
    %19 = arith.addf %18, %14 : vector<4x128xf32>
    %cst_8 = arith.constant 0.000000e+00 : f32
    %20 = vector.broadcast %cst_8 : f32 to vector<4x128xf32>
    %21 = arith.maximumf %9, %20 : vector<4x128xf32>
    %22 = arith.addf %21, %14 : vector<4x128xf32>
    %cst_9 = arith.constant 0.000000e+00 : f32
    %23 = vector.broadcast %cst_9 : f32 to vector<4x128xf32>
    %24 = arith.subf %23, %22 : vector<4x128xf32>
    %cst_10 = arith.constant 2.000000e+00 : f32
    %25 = vector.broadcast %cst_10 : f32 to vector<4x128xf32>
    %26 = arith.mulf %24, %25 : vector<4x128xf32>
    %27 = math.exp %26 : vector<4x128xf32>
    %28 = arith.mulf %27, %19 : vector<4x128xf32>
    %c0_11 = arith.constant 0 : index
    %c0_12 = arith.constant 0 : index
    %29 = vector.load %arg4[%c0_11, %c0_12] : memref<1x128xf32, #tpu.memory_space<vmem>>, vector<1x128xf32>
    %cst_13 = arith.constant dense<0.000000e+00> : vector<128xf32>
    %30 = vector.multi_reduction <add>, %28, %cst_13 [0] : vector<4x128xf32> to vector<128xf32>
    %31 = vector.shape_cast %30 : vector<128xf32> to vector<1x128xf32>
    %32 = arith.addf %29, %31 : vector<1x128xf32>
    %c0_14 = arith.constant 0 : index
    %c0_15 = arith.constant 0 : index
    %33 = vector.load %arg4[%c0_14, %c0_15] : memref<1x128xf32, #tpu.memory_space<vmem>>, vector<1x128xf32>
    tpu.vector_store %arg4[%c0_14, %c0_15], %32 {strides = array<i32>} : memref<1x128xf32, #tpu.memory_space<vmem>>, vector<1x128xf32>,
    return
  }
  func.func @transform_0(%arg0: i32, %arg1: i32) -> (i32, i32) {
    %c1_i32 = arith.constant 1 : i32
    %0 = arith.muli %arg0, %c1_i32 : i32
    %1 = arith.addi %0, %arg1 : i32
    %c0_i32 = arith.constant 0 : i32
    %c0_i32_0 = arith.constant 0 : i32
    return %1, %c0_i32 : i32, i32
  }
  func.func @transform_1(%arg0: i32, %arg1: i32) -> (i32, i32) {
    %c1_i32 = arith.constant 1 : i32
    %0 = arith.muli %arg0, %c1_i32 : i32
    %1 = arith.addi %0, %arg1 : i32
    %c0_i32 = arith.constant 0 : i32
    %c0_i32_0 = arith.constant 0 : i32
    return %1, %c0_i32 : i32, i32
  }
  func.func @transform_2(%arg0: i32, %arg1: i32) -> (i32, i32) {
    %c0_i32 = arith.constant 0 : i32
    %c0_i32_0 = arith.constant 0 : i32
    return %c0_i32, %arg0 : i32, i32
  }
}

</mosaic_0001>

<bundles_post_ra>
// kernel: tpu_custom_call.1
= control target key start
LH: loop header
LB: loop body
LE: loop exit
PB: predicated region body
PF: predicated region fallthrough
CT: control target
= control target key end

     0   :  { %7 = vsyncpa [#allocation3], 0  ;;  %s209_s0 = inlined_call_operand.hbm [shape: f32[4,128], index: 0, kind: input, shape index: {}]   ;;  %s210_s1 = inlined_call_operand.hbm [shape: f32[4,128], index: 1, kind: input, shape index: {}]   ;;  %s211_s2 = inlined_call_operand.hbm [shape: f32[1,128], index: 2, kind: output, shape index: {}]  }
   0x1   :  { %8 = vsyncpa [#allocation6], 0 }
   0x2   :  { %9 = vsyncpa [#allocation4], 0  ;;  %s181_s9 = smov [#allocation2]   ;;  %s182_s11 = smov [#allocation5]  }
   0x3   :  { %s19_s10 = sshll.u32 %s181_s9, 4  ;;  %s32_s12 = sshll.u32 %s182_s11, 4  ;;  %s20_s10 = int_to_ptr.vmem [resolvable:$true] %s19_s10  ;;  %s33_s12 = int_to_ptr.vmem [resolvable:$true] %s32_s12 }
   0x4   :  { %s123_s13 = scalar_lea.vmem %s20_s10, 64  ;;  %p128_p1 = scmp.lt.s32.totalorder %s20_s10, %s20_s10 }
   0x5   :  { %p124_p0 = scmp.ne.s32.totalorder %s20_s10, %s123_s13  ;;  %p129_p2 = scmp.lt.s32.totalorder %s123_s13, %s123_s13 }
   0x7   :  { %p130_p3 = por %p129_p2, %p128_p1 }
   0x9   :  { %p131_p4 = pnand %p130_p3, %p124_p0 }
   0xb   :  { %134 = shalt.err (!%p131_p4)
}
   0xc   :  { %22 = dma.hbm_to_vmem [thread:$0]  %s209_s0, 64, %s20_s10, [#allocation3]  }
   0xd   :  { %s143_s16 = scalar_lea.vmem %s33_s12, 64  ;;  %p148_p6 = scmp.lt.s32.totalorder %s33_s12, %s33_s12 }
   0xe   :  { %p144_p5 = scmp.ne.s32.totalorder %s33_s12, %s143_s16  ;;  %p149_p7 = scmp.lt.s32.totalorder %s143_s16, %s143_s16 }
  0x10   :  { %p150_p8 = por %p149_p7, %p148_p6 }
  0x12   :  { %p151_p9 = pnand %p150_p8, %p144_p5 }
  0x14   :  { %154 = shalt.err (!%p151_p9)
}
  0x15   :  { %35 = dma.hbm_to_vmem [thread:$0]  %s210_s1, 64, %s33_s12, [#allocation6]  }
  0x16   :  { %175 = dma.done.wait [#allocation3], 64  }
  0x17   :  { %176 = vsyncadd [#allocation3], 4294967232 }
  0x18   :  { %177 = dma.done.wait [#allocation6], 64  }
  0x19   :  { %178 = vsyncadd [#allocation6], 4294967232  ;;  %v183_v0 = vmov 0.0   ;;  %v50_v1 = vld [vmem:[#allocation5] sm:$0xf]  ;;  %vm78_vm1 = vcmask 1043456  }
  0x1a   :  { %48 = vst [vmem:[#allocation7] sm:$0x1] %v183_v0  ;;  %v51_v2 = vmul.f32 2.0, %v50_v1  ;;  %v49_v3 = vld [vmem:[#allocation2] sm:$0xf]  ;;  %s184_s0 = smov [#allocation7]  }
  0x1b   :  { %s94_s1 = sshll.u32 %s184_s0, 4  ;;  %s95_s1 = int_to_ptr.vmem [resolvable:$true] %s94_s1 }
  0x1c   :  { %v104_v4 = vadd.f32 -1.0, %v51_v2  ;;  %s155_s19 = scalar_lea.vmem %s95_s1, 16  ;;  %s159_s20 = scalar_lea.vmem %s95_s1, 32 }
  0x1d   :  { %p156_p10 = scmp.ne.s32.totalorder %s95_s1, %s155_s19  ;;  %p160_p11 = scmp.lt.s32.totalorder %s95_s1, %s95_s1 }
  0x1e   :  { %v53_v5 = vmul.f32 %v104_v4, %v49_v3  ;;  %p161_p12 = scmp.lt.s32.totalorder %s159_s20, %s155_s19 }
  0x20   :  { %v54_v6 = vand.u32 2147483647, %v53_v5  ;;  %v70_v16 = vmax.f32 %v53_v5, 0.0  ;;  %v67_v23 = vsub.f32 0.0, %v53_v5  ;;  %p162_p13 = por %p161_p12, %p160_p11 }
  0x21   :  { %v77_v34 = vld [vmem:[#allocation7] sm:$0x1] }
  0x22   :  { %v55_v7 = vsub.f32 0.0, %v54_v6  ;;  %v68_v24 = vmax.f32 %v67_v23, 0.0  ;;  %p163_p0 = pnand %p162_p13, %p156_p10 }
  0x24   :  { %v56_v8 = vmul.f32 1.442695, %v55_v7 }
  0x26   :  { %109 = vpow2.f32 %v56_v8 }
  0x33   :  { %v110_v9 = vpop.eup %109 }
  0x34   :  { %v58_v10 = vadd.f32 1.0, %v110_v9  ;;  %v61_v11 = vmul.f32 -0.5, %v110_v9  ;;  %v64_v13 = vand.u32 2147483647, %v110_v9 }
  0x36   :  { %111 = vlog2.f32 %v58_v10  ;;  %v62_v12 = vadd.f32 1.0, %v61_v11  ;;  %vm65_vm0 = vcmp.lt.f32.partialorder %v64_v13, 0.0004427343 }
  0x38   :  { %v63_v14 = vmul.f32 %v110_v9, %v62_v12 }
  0x43   :  { %v112_v15 = vpop.eup %111 }
  0x44   :  { %v60_v17 = vmul.f32 0.6931472, %v112_v15 }
  0x46   :  { %v66_v18 = vsel %vm65_vm0, %v63_v14, %v60_v17 }
  0x47   :  { %v71_v19 = vadd.f32 %v70_v16, %v66_v18  ;;  %v69_v25 = vadd.f32 %v68_v24, %v66_v18 }
  0x49   :  { %v72_v20 = vsub.f32 0.0, %v71_v19 }
  0x4b   :  { %v73_v21 = vmul.f32 2.0, %v72_v20 }
  0x4d   :  { %v74_v22 = vmul.f32 1.442695, %v73_v21 }
  0x4f   :  { %113 = vpow2.f32 %v74_v22 }
  0x5c   :  { %v114_v26 = vpop.eup %113 }
  0x5d   :  { %v76_v27 = vmul.f32 %v114_v26, %v69_v25 }
  0x5f   :  { %v79_v28 = vsel %vm78_vm1, %v76_v27, 0.0 }
  0x60   :  { %v80_v29 = vrot.slane %v79_v28, 4 }
  0x62   :  { %v81_v30 = vadd.f32 %v80_v29, %v79_v28 }
  0x64   :  { %v82_v31 = vrot.slane %v81_v30, 2 }
  0x66   :  { %v83_v32 = vadd.f32 %v82_v31, %v81_v30 }
  0x68   :  { %v84_v33 = vrot.slane %v83_v32, 1 }
  0x6a   :  { %v85_v35 = vadd.f32 %v84_v33, %v83_v32 }
  0x6c   :  { %v86_v36 = vadd.f32 %v85_v35, %v77_v34 }
  0x6e   :  { %87 = vst [vmem:[#allocation7] sm:$0x1] %v86_v36 }
  0x6f   :  { %166 = shalt.err (!%p163_p0)
}
  0x70   :  { %97 = dma.vmem_to_hbm [thread:$0]  %s95_s1, 16, %s211_s2, [#allocation4]  }
  0x71   :  { %179 = dma.done.wait [#allocation4], 16  }
  0x72   :  { %180 = vsyncadd [#allocation4], 4294967280 }
  0x73   :  { %101 = vsyncpa [#allocation3], 1 }
  0x74   :  { %102 = vsyncpa [#allocation6], 1 }
  0x75   :  { %103 = vsyncpa [#allocation4], 1 }

</bundles_post_ra>
